<compile_context>
chip_gen: v6e
topology: v6e:2x2x1
jax: 0.10.0
libtpu: 0.0.40
codegen_flags: <defaults>
</compile_context>

<pallas_src>
import numpy as np

import jax
import jax.numpy as jnp
from jax.experimental import pallas as pl
from jax.experimental.pallas import tpu as pltpu


# ------------------------------------------------------------------------- kernel body
def _make_subblock_kernel(N, H, W, f_in, f_out, eps=1e-5):
    NH = N * H
    L_in = W * f_in
    L_out = W * f_out
    add_identity_residual = (f_out == f_in)   # residual is None and not no_residual
    has_bn1 = (f_in > 1)                      # MEBatchNorm(f_in) if f_in > 1 else None
    inv_cnt = 1.0 / float(N * H * W)          # BatchNorm population size
    inv_hw = 1.0 / float(H * W)               # SE global-average-pool size

    def chan_reduce(s, cdim):
        # s: (R, L) lane-dense, lane = w*cdim + c.  log2(W) circular lane rolls (XLU)
        # accumulate the W lane-groups; every lane ends up holding the full per-channel
        # sum, replicated across w.  Requires L == W*cdim (the logical wrap point).
        lanes = s.shape[-1]
        axis = s.ndim - 1                     # pltpu.roll requires a non-negative axis
        shift = cdim
        while shift < lanes:
            s = s + pltpu.roll(s, shift, axis)
            shift *= 2
        return s

    def batchnorm(z, cdim, g_ref, b_ref):
        # One-pass training-mode batch statistics: var = E[z^2] - E[z]^2.
        s1 = jnp.sum(z, axis=0, keepdims=True)
        s2 = jnp.sum(z * z, axis=0, keepdims=True)
        mean = chan_reduce(s1, cdim) * inv_cnt
        var = jnp.maximum(chan_reduce(s2, cdim) * inv_cnt - mean * mean, 0.0)
        return (z - mean) * (jax.lax.rsqrt(var + eps) * g_ref[...]) + b_ref[...]

    def conv3x3(z, bw_ref):
        # z: (NH, L) f32.  bw_ref: (3*L, L_out) bf16 stacked banded block weights
        # [B_dy0; B_dy1; B_dy2].  H-direction taps = sublane rolls + sample-boundary
        # masks (no (NH,NH) shift matrices); W-direction taps / zero padding are baked
        # into the banded weights.  One lane-dense K = 3*L bf16 MXU push per conv.
        rows = jax.lax.broadcasted_iota(jnp.int32, z.shape, 0)
        top = (rows % H) == 0
        bot = (rows % H) == (H - 1)
        z_up = jnp.where(top, 0.0, pltpu.roll(z, 1, 0))        # row i <- z[i-1]
        z_dn = jnp.where(bot, 0.0, pltpu.roll(z, NH - 1, 0))   # row i <- z[i+1]
        lhs = jnp.concatenate([z_up, z, z_dn], axis=1).astype(jnp.bfloat16)
        return jnp.dot(lhs, bw_ref[...], preferred_element_type=jnp.float32)

    def kernel(x_ref, g1_ref, b1_ref, bw1_ref, g2_ref, b2_ref, bw2_ref,
               wse1_ref, bse1_ref, wse2_ref, bse2_ref, o_ref):
        x2 = x_ref[...].astype(jnp.float32).reshape(NH, L_in)   # (NH, W*f_in)

        # ---- first_batch + first_relu (== residual_portion when f_out == f_in) ----
        if has_bn1:
            h0 = jnp.maximum(batchnorm(x2, f_in, g1_ref, b1_ref), 0.0)
        else:
            h0 = jnp.maximum(x2, 0.0)

        c1 = conv3x3(h0, bw1_ref)                                # (NH, L_out)
        h1 = jnp.maximum(batchnorm(c1, f_out, g2_ref, b2_ref), 0.0)
        c2 = conv3x3(h1, bw2_ref)                                # (NH, L_out)

        # ---- SEBlock: squeeze (sublane sum, no pool matmul) / excite / scale ----
        c2r = c2.reshape(N, H, L_out)
        srow = jnp.sum(c2r, axis=1) * inv_hw                    # (N, L_out)
        s_ld = chan_reduce(srow, f_out)                         # per-channel mean, lane-replicated
        e = jnp.maximum(
            jnp.dot(s_ld, wse1_ref[...], preferred_element_type=jnp.float32)
            + bse1_ref[...], 0.0)                               # (N, hidden)
        zz = jnp.dot(e, wse2_ref[...], preferred_element_type=jnp.float32) + bse2_ref[...]
        gate = jax.nn.sigmoid(zz)                               # EUP; no inf intermediate
        y = c2r * gate[:, None, :]

        # ---- residual ----
        if add_identity_residual:
            y = y + h0.reshape(N, H, L_in)
        # TODO(synk): f_out > f_in uses MEConv(kernel_size=1, stride=2) on sparse
        # coordinates; a stride-2 sparse residual has no dense stride-1-compatible
        # equivalent for the elementwise add, so that branch is not implemented.

        o_ref[...] = y.astype(o_ref.dtype)

    return kernel


# ---------------------------------------------------------------------- wrapper / prep
def _banded_conv_weights(w9, cin, cout, W):
    """(9, cin, cout) taps (k = dy*3 + dx) -> stacked (3*W*cin, W*cout) bf16 banded
    block weights so that conv(z) = [shift_up(z) | z | shift_dn(z)] @ B in the
    lane-dense layout (lane = w*cin + ci).  W-direction zero padding is built in."""
    M = np.zeros((3, W, W), np.float32)
    for dx in range(3):
        for wo in range(W):
            wi = wo + dx - 1
            if 0 <= wi < W:
                M[dx, wi, wo] = 1.0
    wk = np.asarray(w9, np.float32).reshape(3, 3, cin, cout)
    B = np.einsum('dxio,xab->daibo', wk, M)                     # (3, W, cin, W, cout)
    return jnp.asarray(B.reshape(3 * W * cin, W * cout), jnp.bfloat16)


def make_subblock(params, f_in, f_out, N, H, W, eps=1e-5):
    """Builds all lane-dense constants ONCE for a fixed shape and returns a jitted
    forward(x_nchw: (N, f_in, H, W)) -> (N, f_out, H, W)."""
    if f_out > f_in:
        raise NotImplementedError("f_out > f_in (stride-2 sparse residual) not supported")
    assert W >= 2 and (W & (W - 1)) == 0, "W must be a power of two (lane-roll reduce)"
    assert H % 8 == 0, "H must be a multiple of 8 (sublane-aligned reshapes)"

    L_in, L_out = W * f_in, W * f_out
    hidden = int(np.asarray(params["w_se1"]).shape[-1])

    f32 = lambda a: np.asarray(a, np.float32)
    tile_lanes = lambda v, c: jnp.asarray(np.tile(f32(v).reshape(1, c), (1, W)), jnp.float32)

    g1_ld = tile_lanes(params["g1"], f_in) if f_in > 1 else jnp.ones((1, L_in), jnp.float32)
    b1_ld = tile_lanes(params["b1"], f_in) if f_in > 1 else jnp.zeros((1, L_in), jnp.float32)
    g2_ld = tile_lanes(params["g2"], f_out)
    b2_ld = tile_lanes(params["b2"], f_out)
    bw1 = _banded_conv_weights(params["w1"], f_in, f_out, W)     # (3*L_in,  L_out) bf16
    bw2 = _banded_conv_weights(params["w2"], f_out, f_out, W)    # (3*L_out, L_out) bf16
    wse1_ld = jnp.asarray(np.tile(f32(params["w_se1"]), (W, 1)) / float(W), jnp.float32)
    bse1 = jnp.asarray(f32(params["b_se1"]).reshape(1, hidden), jnp.float32)
    wse2_ld = jnp.asarray(np.tile(f32(params["w_se2"]), (1, W)), jnp.float32)
    bse2_ld = tile_lanes(params["b_se2"], f_out)

    kernel = _make_subblock_kernel(N, H, W, f_in, f_out, eps)

    call = pl.pallas_call(
        kernel,
        out_shape=jax.ShapeDtypeStruct((N, H, L_out), jnp.float32),
        in_specs=[pl.BlockSpec(memory_space=pltpu.MemorySpace.VMEM)] * 11,
        out_specs=pl.BlockSpec(memory_space=pltpu.MemorySpace.VMEM),
    )
    # TODO(synk): at production sizes, add a "parallel" grid over the row axis with a
    # two-pass BatchNorm reduction so v7x's second TensorCore and double-buffered DMA
    # are used; at this toy size a single invocation is latency-optimal.

    @jax.jit
    def forward(x_nchw):
        # NCHW -> lane-dense (N, H, W*C) only at this interface boundary; a lane-dense
        # end-to-end network would drop these transposes entirely.
        x_ld = jnp.transpose(x_nchw, (0, 2, 3, 1)).reshape(N, H, L_in).astype(jnp.float32)
        out_ld = call(x_ld, g1_ld, b1_ld, bw1, g2_ld, b2_ld, bw2,
                      wse1_ld, bse1, wse2_ld, bse2_ld)
        return jnp.transpose(out_ld.reshape(N, H, W, f_out), (0, 3, 1, 2))

    return forward


# -------------------------------------------------------------- pure-JAX dense reference
def _subblock_reference(x_nchw, params, f_in, f_out, eps=1e-5):
    N, C, H, W = x_nchw.shape
    x = jnp.transpose(x_nchw, (0, 2, 3, 1)).astype(jnp.float32)  # NHWC

    def bn(z, g, b):
        mu = jnp.mean(z, axis=(0, 1, 2), keepdims=True)
        var = jnp.mean((z - mu) ** 2, axis=(0, 1, 2), keepdims=True)
        return (z - mu) * jax.lax.rsqrt(var + eps) * g.reshape(1, 1, 1, -1) + b.reshape(1, 1, 1, -1)

    def conv3x3(z, w9):
        zp = jnp.pad(z, ((0, 0), (1, 1), (1, 1), (0, 0)))
        out = 0.0
        for dy in range(3):
            for dx in range(3):
                tap = zp[:, dy:dy + H, dx:dx + W, :]
                out = out + jnp.einsum('nhwc,cd->nhwd', tap, w9[dy * 3 + dx])
        return out

    h0 = bn(x, params["g1"], params["b1"]) if f_in > 1 else x
    h0 = jnp.maximum(h0, 0.0)
    c1 = conv3x3(h0, params["w1"])
    h1 = jnp.maximum(bn(c1, params["g2"], params["b2"]), 0.0)
    c2 = conv3x3(h1, params["w2"])
    s = jnp.mean(c2, axis=(1, 2))                                 # (N, f_out)
    e = jnp.maximum(s @ params["w_se1"] + params["b_se1"], 0.0)
    z = e @ params["w_se2"] + params["b_se2"]
    gate = jax.nn.sigmoid(z)
    y = c2 * gate[:, None, None, :]
    if f_out == f_in:
        y = y + h0
    return jnp.transpose(y, (0, 3, 1, 2))


# --------------------------------------------------------------------------------- main
if __name__ == "__main__":
    f_in, f_out = 8, 8            # identity-residual branch of SubBlock
    N, H, W = 2, 16, 16           # W * C = 128 -> fully lane-dense activations
    hidden = max(f_out // 4, 1)   # SE reduction ratio = 4 (assumption for SEBlock)

    key = jax.random.PRNGKey(0)
    ks = jax.random.split(key, 12)

    x = jax.random.normal(ks[0], (N, f_in, H, W), dtype=jnp.float32)
    params = {
        "g1": jax.random.uniform(ks[1], (1, f_in), jnp.float32, 0.5, 1.5),
        "b1": 0.1 * jax.random.normal(ks[2], (1, f_in), dtype=jnp.float32),
        "w1": jax.random.normal(ks[3], (9, f_in, f_out), dtype=jnp.float32)
              * (1.0 / (9.0 * f_in) ** 0.5),
        "g2": jax.random.uniform(ks[4], (1, f_out), jnp.float32, 0.5, 1.5),
        "b2": 0.1 * jax.random.normal(ks[5], (1, f_out), dtype=jnp.float32),
        "w2": jax.random.normal(ks[6], (9, f_out, f_out), dtype=jnp.float32)
              * (1.0 / (9.0 * f_out) ** 0.5),
        "w_se1": jax.random.normal(ks[7], (f_out, hidden), dtype=jnp.float32)
                 * (1.0 / f_out ** 0.5),
        "b_se1": jnp.zeros((1, hidden), jnp.float32),
        "w_se2": jax.random.normal(ks[8], (hidden, f_out), dtype=jnp.float32)
                 * (1.0 / hidden ** 0.5),
        "b_se2": jnp.zeros((1, f_out), jnp.float32),
    }

    forward = make_subblock(params, f_in, f_out, N, H, W)
    y = forward(x)
    jax.block_until_ready(y)
    assert y.shape == (N, f_out, H, W)

    # Sanity check against a plain-JAX f32 dense reference.  Tolerance covers the
    # bf16 MXU operands (conv activations/weights) with f32 accumulation and the
    # one-pass BatchNorm statistics.
    y_ref = _subblock_reference(x, params, f_in, f_out)
    scale = float(jnp.max(jnp.abs(y_ref))) + 1.0
    err = float(jnp.max(jnp.abs(y - y_ref)))
    assert err <= 3e-2 * scale, f"mismatch vs reference: max abs err = {err}"

    print("KERNEL_OK")
</pallas_src>

<mosaic_0001>
module attributes {stable_mosaic.version = 11 : i64} {
  func.func @kernel(%arg0: memref<2x16x128xf32, #tpu.memory_space<vmem>>, %arg1: memref<1x128xf32, #tpu.memory_space<vmem>>, %arg2: memref<1x128xf32, #tpu.memory_space<vmem>>, %arg3: memref<384x128xbf16, #tpu.memory_space<vmem>>, %arg4: memref<1x128xf32, #tpu.memory_space<vmem>>, %arg5: memref<1x128xf32, #tpu.memory_space<vmem>>, %arg6: memref<384x128xbf16, #tpu.memory_space<vmem>>, %arg7: memref<128x2xf32, #tpu.memory_space<vmem>>, %arg8: memref<1x2xf32, #tpu.memory_space<vmem>>, %arg9: memref<2x128xf32, #tpu.memory_space<vmem>>, %arg10: memref<1x128xf32, #tpu.memory_space<vmem>>, %arg11: memref<2x16x128xf32, #tpu.memory_space<vmem>>) attributes {dimension_semantics = [], scalar_prefetch = 0 : i64, scratch_operands = 0 : i64, tpu.core_type = #tpu.core_type<tc>} {
    %c0 = arith.constant 0 : index
    %c0_0 = arith.constant 0 : index
    %c0_1 = arith.constant 0 : index
    %0 = vector.load %arg0[%c0, %c0_0, %c0_1] : memref<2x16x128xf32, #tpu.memory_space<vmem>>, vector<2x16x128xf32>
    %1 = vector.shape_cast %0 : vector<2x16x128xf32> to vector<32x128xf32>
    %cst = arith.constant dense<0.000000e+00> : vector<128xf32>
    %2 = vector.multi_reduction <add>, %1, %cst [0] : vector<32x128xf32> to vector<128xf32>
    %3 = vector.shape_cast %2 : vector<128xf32> to vector<1x128xf32>
    %4 = arith.mulf %1, %1 : vector<32x128xf32>
    %cst_2 = arith.constant dense<0.000000e+00> : vector<128xf32>
    %5 = vector.multi_reduction <add>, %4, %cst_2 [0] : vector<32x128xf32> to vector<128xf32>
    %6 = vector.shape_cast %5 : vector<128xf32> to vector<1x128xf32>
    %c8_i32 = arith.constant 8 : i32
    %7 = tpu.dynamic_rotate %3 by %c8_i32 dim 1 : vector<1x128xf32>, i32 -> vector<1x128xf32>
    %8 = arith.addf %3, %7 : vector<1x128xf32>
    %c16_i32 = arith.constant 16 : i32
    %9 = tpu.dynamic_rotate %8 by %c16_i32 dim 1 : vector<1x128xf32>, i32 -> vector<1x128xf32>
    %10 = arith.addf %8, %9 : vector<1x128xf32>
    %c32_i32 = arith.constant 32 : i32
    %11 = tpu.dynamic_rotate %10 by %c32_i32 dim 1 : vector<1x128xf32>, i32 -> vector<1x128xf32>
    %12 = arith.addf %10, %11 : vector<1x128xf32>
    %c64_i32 = arith.constant 64 : i32
    %13 = tpu.dynamic_rotate %12 by %c64_i32 dim 1 : vector<1x128xf32>, i32 -> vector<1x128xf32>
    %14 = arith.addf %12, %13 : vector<1x128xf32>
    %cst_3 = arith.constant 0.001953125 : f32
    %15 = vector.broadcast %cst_3 : f32 to vector<1x128xf32>
    %16 = arith.mulf %14, %15 : vector<1x128xf32>
    %c8_i32_4 = arith.constant 8 : i32
    %17 = tpu.dynamic_rotate %6 by %c8_i32_4 dim 1 : vector<1x128xf32>, i32 -> vector<1x128xf32>
    %18 = arith.addf %6, %17 : vector<1x128xf32>
    %c16_i32_5 = arith.constant 16 : i32
    %19 = tpu.dynamic_rotate %18 by %c16_i32_5 dim 1 : vector<1x128xf32>, i32 -> vector<1x128xf32>
    %20 = arith.addf %18, %19 : vector<1x128xf32>
    %c32_i32_6 = arith.constant 32 : i32
    %21 = tpu.dynamic_rotate %20 by %c32_i32_6 dim 1 : vector<1x128xf32>, i32 -> vector<1x128xf32>
    %22 = arith.addf %20, %21 : vector<1x128xf32>
    %c64_i32_7 = arith.constant 64 : i32
    %23 = tpu.dynamic_rotate %22 by %c64_i32_7 dim 1 : vector<1x128xf32>, i32 -> vector<1x128xf32>
    %24 = arith.addf %22, %23 : vector<1x128xf32>
    %cst_8 = arith.constant 0.001953125 : f32
    %25 = vector.broadcast %cst_8 : f32 to vector<1x128xf32>
    %26 = arith.mulf %24, %25 : vector<1x128xf32>
    %27 = arith.mulf %16, %16 : vector<1x128xf32>
    %28 = arith.subf %26, %27 : vector<1x128xf32>
    %cst_9 = arith.constant 0.000000e+00 : f32
    %29 = vector.broadcast %cst_9 : f32 to vector<1x128xf32>
    %30 = arith.maximumf %28, %29 : vector<1x128xf32>
    %31 = vector.broadcast %16 : vector<1x128xf32> to vector<32x128xf32>
    %32 = arith.subf %1, %31 : vector<32x128xf32>
    %cst_10 = arith.constant 9.99999974E-6 : f32
    %33 = vector.broadcast %cst_10 : f32 to vector<1x128xf32>
    %34 = arith.addf %30, %33 : vector<1x128xf32>
    %35 = math.rsqrt %34 : vector<1x128xf32>
    %c0_11 = arith.constant 0 : index
    %c0_12 = arith.constant 0 : index
    %36 = vector.load %arg1[%c0_11, %c0_12] : memref<1x128xf32, #tpu.memory_space<vmem>>, vector<1x128xf32>
    %37 = arith.mulf %35, %36 : vector<1x128xf32>
    %38 = vector.broadcast %37 : vector<1x128xf32> to vector<32x128xf32>
    %39 = arith.mulf %32, %38 : vector<32x128xf32>
    %c0_13 = arith.constant 0 : index
    %c0_14 = arith.constant 0 : index
    %40 = vector.load %arg2[%c0_13, %c0_14] : memref<1x128xf32, #tpu.memory_space<vmem>>, vector<1x128xf32>
    %41 = vector.broadcast %40 : vector<1x128xf32> to vector<32x128xf32>
    %42 = arith.addf %39, %41 : vector<32x128xf32>
    %cst_15 = arith.constant 0.000000e+00 : f32
    %43 = vector.broadcast %cst_15 : f32 to vector<32x128xf32>
    %44 = arith.maximumf %42, %43 : vector<32x128xf32>
    %45 = tpu.iota {dimensions = array<i32: 0>} : vector<32x128xi32>
    %c16_i32_16 = arith.constant 16 : i32
    %c0_i32 = arith.constant 0 : i32
    %46 = arith.cmpi eq, %c16_i32_16, %c0_i32 : i32
    %c1_i32 = arith.constant 1 : i32
    %47 = arith.select %46, %c1_i32, %c16_i32_16 : i32
    %48 = vector.broadcast %47 : i32 to vector<32x128xi32>
    %49 = arith.remsi %45, %48 : vector<32x128xi32>
    %c0_i32_17 = arith.constant 0 : i32
    %50 = vector.broadcast %c0_i32_17 : i32 to vector<32x128xi32>
    %51 = arith.cmpi ne, %49, %50 : vector<32x128xi32>
    %c0_i32_18 = arith.constant 0 : i32
    %52 = vector.broadcast %c0_i32_18 : i32 to vector<32x128xi32>
    %53 = arith.cmpi slt, %49, %52 : vector<32x128xi32>
    %c0_i32_19 = arith.constant 0 : i32
    %54 = arith.cmpi slt, %47, %c0_i32_19 : i32
    %55 = vector.broadcast %54 : i1 to vector<32x128xi1>
    %56 = vector.broadcast %55 : vector<32x128xi1> to vector<32x128xi1>
    %57 = arith.xori %53, %56 : vector<32x128xi1>
    %58 = arith.andi %57, %51 : vector<32x128xi1>
    %59 = vector.broadcast %47 : i32 to vector<32x128xi32>
    %60 = arith.addi %49, %59 : vector<32x128xi32>
    %61 = arith.select %58, %60, %49 : vector<32x128xi1>, vector<32x128xi32>
    %c0_i32_20 = arith.constant 0 : i32
    %62 = vector.broadcast %c0_i32_20 : i32 to vector<32x128xi32>
    %63 = arith.cmpi eq, %61, %62 : vector<32x128xi32>
    %c16_i32_21 = arith.constant 16 : i32
    %c0_i32_22 = arith.constant 0 : i32
    %64 = arith.cmpi eq, %c16_i32_21, %c0_i32_22 : i32
    %c1_i32_23 = arith.constant 1 : i32
    %65 = arith.select %64, %c1_i32_23, %c16_i32_21 : i32
    %66 = vector.broadcast %65 : i32 to vector<32x128xi32>
    %67 = arith.remsi %45, %66 : vector<32x128xi32>
    %c0_i32_24 = arith.constant 0 : i32
    %68 = vector.broadcast %c0_i32_24 : i32 to vector<32x128xi32>
    %69 = arith.cmpi ne, %67, %68 : vector<32x128xi32>
    %c0_i32_25 = arith.constant 0 : i32
    %70 = vector.broadcast %c0_i32_25 : i32 to vector<32x128xi32>
    %71 = arith.cmpi slt, %67, %70 : vector<32x128xi32>
    %c0_i32_26 = arith.constant 0 : i32
    %72 = arith.cmpi slt, %65, %c0_i32_26 : i32
    %73 = vector.broadcast %72 : i1 to vector<32x128xi1>
    %74 = vector.broadcast %73 : vector<32x128xi1> to vector<32x128xi1>
    %75 = arith.xori %71, %74 : vector<32x128xi1>
    %76 = arith.andi %75, %69 : vector<32x128xi1>
    %77 = vector.broadcast %65 : i32 to vector<32x128xi32>
    %78 = arith.addi %67, %77 : vector<32x128xi32>
    %79 = arith.select %76, %78, %67 : vector<32x128xi1>, vector<32x128xi32>
    %c15_i32 = arith.constant 15 : i32
    %80 = vector.broadcast %c15_i32 : i32 to vector<32x128xi32>
    %81 = arith.cmpi eq, %79, %80 : vector<32x128xi32>
    %c1_i32_27 = arith.constant 1 : i32
    %82 = tpu.dynamic_rotate %44 by %c1_i32_27 dim 0 : vector<32x128xf32>, i32 -> vector<32x128xf32>
    %cst_28 = arith.constant 0.000000e+00 : f32
    %83 = vector.broadcast %cst_28 : f32 to vector<32x128xf32>
    %84 = arith.select %63, %83, %82 : vector<32x128xi1>, vector<32x128xf32>
    %c31_i32 = arith.constant 31 : i32
    %85 = tpu.dynamic_rotate %44 by %c31_i32 dim 0 : vector<32x128xf32>, i32 -> vector<32x128xf32>
    %cst_29 = arith.constant 0.000000e+00 : f32
    %86 = vector.broadcast %cst_29 : f32 to vector<32x128xf32>
    %87 = arith.select %81, %86, %85 : vector<32x128xi1>, vector<32x128xf32>
    %88 = tpu.concatenate %84, %44, %87 in 1 : vector<32x128xf32>, vector<32x128xf32>, vector<32x128xf32> -> vector<32x384xf32>
    %89 = arith.truncf %88 : vector<32x384xf32> to vector<32x384xbf16>
    %c0_30 = arith.constant 0 : index
    %c0_31 = arith.constant 0 : index
    %90 = vector.load %arg3[%c0_30, %c0_31] : memref<384x128xbf16, #tpu.memory_space<vmem>>, vector<384x128xbf16>
    %cst_32 = arith.constant dense<0.000000e+00> : vector<32x128xf32>
    %91 = tpu.matmul %89, %90, %cst_32 {dimension_numbers = #tpu.dot_dimension_numbers<[1], [0], [0], [1], [0, 0, 1, 1], [], []>} : vector<32x384xbf16>, vector<384x128xbf16>, vector<32x128xf32> -> vector<32x128xf32>
    %cst_33 = arith.constant dense<0.000000e+00> : vector<128xf32>
    %92 = vector.multi_reduction <add>, %91, %cst_33 [0] : vector<32x128xf32> to vector<128xf32>
    %93 = vector.shape_cast %92 : vector<128xf32> to vector<1x128xf32>
    %94 = arith.mulf %91, %91 : vector<32x128xf32>
    %cst_34 = arith.constant dense<0.000000e+00> : vector<128xf32>
    %95 = vector.multi_reduction <add>, %94, %cst_34 [0] : vector<32x128xf32> to vector<128xf32>
    %96 = vector.shape_cast %95 : vector<128xf32> to vector<1x128xf32>
    %c8_i32_35 = arith.constant 8 : i32
    %97 = tpu.dynamic_rotate %93 by %c8_i32_35 dim 1 : vector<1x128xf32>, i32 -> vector<1x128xf32>
    %98 = arith.addf %93, %97 : vector<1x128xf32>
    %c16_i32_36 = arith.constant 16 : i32
    %99 = tpu.dynamic_rotate %98 by %c16_i32_36 dim 1 : vector<1x128xf32>, i32 -> vector<1x128xf32>
    %100 = arith.addf %98, %99 : vector<1x128xf32>
    %c32_i32_37 = arith.constant 32 : i32
    %101 = tpu.dynamic_rotate %100 by %c32_i32_37 dim 1 : vector<1x128xf32>, i32 -> vector<1x128xf32>
    %102 = arith.addf %100, %101 : vector<1x128xf32>
    %c64_i32_38 = arith.constant 64 : i32
    %103 = tpu.dynamic_rotate %102 by %c64_i32_38 dim 1 : vector<1x128xf32>, i32 -> vector<1x128xf32>
    %104 = arith.addf %102, %103 : vector<1x128xf32>
    %cst_39 = arith.constant 0.001953125 : f32
    %105 = vector.broadcast %cst_39 : f32 to vector<1x128xf32>
    %106 = arith.mulf %104, %105 : vector<1x128xf32>
    %c8_i32_40 = arith.constant 8 : i32
    %107 = tpu.dynamic_rotate %96 by %c8_i32_40 dim 1 : vector<1x128xf32>, i32 -> vector<1x128xf32>
    %108 = arith.addf %96, %107 : vector<1x128xf32>
    %c16_i32_41 = arith.constant 16 : i32
    %109 = tpu.dynamic_rotate %108 by %c16_i32_41 dim 1 : vector<1x128xf32>, i32 -> vector<1x128xf32>
    %110 = arith.addf %108, %109 : vector<1x128xf32>
    %c32_i32_42 = arith.constant 32 : i32
    %111 = tpu.dynamic_rotate %110 by %c32_i32_42 dim 1 : vector<1x128xf32>, i32 -> vector<1x128xf32>
    %112 = arith.addf %110, %111 : vector<1x128xf32>
    %c64_i32_43 = arith.constant 64 : i32
    %113 = tpu.dynamic_rotate %112 by %c64_i32_43 dim 1 : vector<1x128xf32>, i32 -> vector<1x128xf32>
    %114 = arith.addf %112, %113 : vector<1x128xf32>
    %cst_44 = arith.constant 0.001953125 : f32
    %115 = vector.broadcast %cst_44 : f32 to vector<1x128xf32>
    %116 = arith.mulf %114, %115 : vector<1x128xf32>
    %117 = arith.mulf %106, %106 : vector<1x128xf32>
    %118 = arith.subf %116, %117 : vector<1x128xf32>
    %cst_45 = arith.constant 0.000000e+00 : f32
    %119 = vector.broadcast %cst_45 : f32 to vector<1x128xf32>
    %120 = arith.maximumf %118, %119 : vector<1x128xf32>
    %121 = vector.broadcast %106 : vector<1x128xf32> to vector<32x128xf32>
    %122 = arith.subf %91, %121 : vector<32x128xf32>
    %cst_46 = arith.constant 9.99999974E-6 : f32
    %123 = vector.broadcast %cst_46 : f32 to vector<1x128xf32>
    %124 = arith.addf %120, %123 : vector<1x128xf32>
    %125 = math.rsqrt %124 : vector<1x128xf32>
    %c0_47 = arith.constant 0 : index
    %c0_48 = arith.constant 0 : index
    %126 = vector.load %arg4[%c0_47, %c0_48] : memref<1x128xf32, #tpu.memory_space<vmem>>, vector<1x128xf32>
    %127 = arith.mulf %125, %126 : vector<1x128xf32>
    %128 = vector.broadcast %127 : vector<1x128xf32> to vector<32x128xf32>
    %129 = arith.mulf %122, %128 : vector<32x128xf32>
    %c0_49 = arith.constant 0 : index
    %c0_50 = arith.constant 0 : index
    %130 = vector.load %arg5[%c0_49, %c0_50] : memref<1x128xf32, #tpu.memory_space<vmem>>, vector<1x128xf32>
    %131 = vector.broadcast %130 : vector<1x128xf32> to vector<32x128xf32>
    %132 = arith.addf %129, %131 : vector<32x128xf32>
    %cst_51 = arith.constant 0.000000e+00 : f32
    %133 = vector.broadcast %cst_51 : f32 to vector<32x128xf32>
    %134 = arith.maximumf %132, %133 : vector<32x128xf32>
    %135 = tpu.iota {dimensions = array<i32: 0>} : vector<32x128xi32>
    %c16_i32_52 = arith.constant 16 : i32
    %c0_i32_53 = arith.constant 0 : i32
    %136 = arith.cmpi eq, %c16_i32_52, %c0_i32_53 : i32
    %c1_i32_54 = arith.constant 1 : i32
    %137 = arith.select %136, %c1_i32_54, %c16_i32_52 : i32
    %138 = vector.broadcast %137 : i32 to vector<32x128xi32>
    %139 = arith.remsi %135, %138 : vector<32x128xi32>
    %c0_i32_55 = arith.constant 0 : i32
    %140 = vector.broadcast %c0_i32_55 : i32 to vector<32x128xi32>
    %141 = arith.cmpi ne, %139, %140 : vector<32x128xi32>
    %c0_i32_56 = arith.constant 0 : i32
    %142 = vector.broadcast %c0_i32_56 : i32 to vector<32x128xi32>
    %143 = arith.cmpi slt, %139, %142 : vector<32x128xi32>
    %c0_i32_57 = arith.constant 0 : i32
    %144 = arith.cmpi slt, %137, %c0_i32_57 : i32
    %145 = vector.broadcast %144 : i1 to vector<32x128xi1>
    %146 = vector.broadcast %145 : vector<32x128xi1> to vector<32x128xi1>
    %147 = arith.xori %143, %146 : vector<32x128xi1>
    %148 = arith.andi %147, %141 : vector<32x128xi1>
    %149 = vector.broadcast %137 : i32 to vector<32x128xi32>
    %150 = arith.addi %139, %149 : vector<32x128xi32>
    %151 = arith.select %148, %150, %139 : vector<32x128xi1>, vector<32x128xi32>
    %c0_i32_58 = arith.constant 0 : i32
    %152 = vector.broadcast %c0_i32_58 : i32 to vector<32x128xi32>
    %153 = arith.cmpi eq, %151, %152 : vector<32x128xi32>
    %c16_i32_59 = arith.constant 16 : i32
    %c0_i32_60 = arith.constant 0 : i32
    %154 = arith.cmpi eq, %c16_i32_59, %c0_i32_60 : i32
    %c1_i32_61 = arith.constant 1 : i32
    %155 = arith.select %154, %c1_i32_61, %c16_i32_59 : i32
    %156 = vector.broadcast %155 : i32 to vector<32x128xi32>
    %157 = arith.remsi %135, %156 : vector<32x128xi32>
    %c0_i32_62 = arith.constant 0 : i32
    %158 = vector.broadcast %c0_i32_62 : i32 to vector<32x128xi32>
    %159 = arith.cmpi ne, %157, %158 : vector<32x128xi32>
    %c0_i32_63 = arith.constant 0 : i32
    %160 = vector.broadcast %c0_i32_63 : i32 to vector<32x128xi32>
    %161 = arith.cmpi slt, %157, %160 : vector<32x128xi32>
    %c0_i32_64 = arith.constant 0 : i32
    %162 = arith.cmpi slt, %155, %c0_i32_64 : i32
    %163 = vector.broadcast %162 : i1 to vector<32x128xi1>
    %164 = vector.broadcast %163 : vector<32x128xi1> to vector<32x128xi1>
    %165 = arith.xori %161, %164 : vector<32x128xi1>
    %166 = arith.andi %165, %159 : vector<32x128xi1>
    %167 = vector.broadcast %155 : i32 to vector<32x128xi32>
    %168 = arith.addi %157, %167 : vector<32x128xi32>
    %169 = arith.select %166, %168, %157 : vector<32x128xi1>, vector<32x128xi32>
    %c15_i32_65 = arith.constant 15 : i32
    %170 = vector.broadcast %c15_i32_65 : i32 to vector<32x128xi32>
    %171 = arith.cmpi eq, %169, %170 : vector<32x128xi32>
    %c1_i32_66 = arith.constant 1 : i32
    %172 = tpu.dynamic_rotate %134 by %c1_i32_66 dim 0 : vector<32x128xf32>, i32 -> vector<32x128xf32>
    %cst_67 = arith.constant 0.000000e+00 : f32
    %173 = vector.broadcast %cst_67 : f32 to vector<32x128xf32>
    %174 = arith.select %153, %173, %172 : vector<32x128xi1>, vector<32x128xf32>
    %c31_i32_68 = arith.constant 31 : i32
    %175 = tpu.dynamic_rotate %134 by %c31_i32_68 dim 0 : vector<32x128xf32>, i32 -> vector<32x128xf32>
    %cst_69 = arith.constant 0.000000e+00 : f32
    %176 = vector.broadcast %cst_69 : f32 to vector<32x128xf32>
    %177 = arith.select %171, %176, %175 : vector<32x128xi1>, vector<32x128xf32>
    %178 = tpu.concatenate %174, %134, %177 in 1 : vector<32x128xf32>, vector<32x128xf32>, vector<32x128xf32> -> vector<32x384xf32>
    %179 = arith.truncf %178 : vector<32x384xf32> to vector<32x384xbf16>
    %c0_70 = arith.constant 0 : index
    %c0_71 = arith.constant 0 : index
    %180 = vector.load %arg6[%c0_70, %c0_71] : memref<384x128xbf16, #tpu.memory_space<vmem>>, vector<384x128xbf16>
    %cst_72 = arith.constant dense<0.000000e+00> : vector<32x128xf32>
    %181 = tpu.matmul %179, %180, %cst_72 {dimension_numbers = #tpu.dot_dimension_numbers<[1], [0], [0], [1], [0, 0, 1, 1], [], []>} : vector<32x384xbf16>, vector<384x128xbf16>, vector<32x128xf32> -> vector<32x128xf32>
    %182 = vector.shape_cast %181 : vector<32x128xf32> to vector<2x16x128xf32>
    %cst_73 = arith.constant dense<0.000000e+00> : vector<2x128xf32>
    %183 = vector.multi_reduction <add>, %182, %cst_73 [1] : vector<2x16x128xf32> to vector<2x128xf32>
    %cst_74 = arith.constant 3.906250e-03 : f32
    %184 = vector.broadcast %cst_74 : f32 to vector<2x128xf32>
    %185 = arith.mulf %183, %184 : vector<2x128xf32>
    %c8_i32_75 = arith.constant 8 : i32
    %186 = tpu.dynamic_rotate %185 by %c8_i32_75 dim 1 : vector<2x128xf32>, i32 -> vector<2x128xf32>
    %187 = arith.addf %185, %186 : vector<2x128xf32>
    %c16_i32_76 = arith.constant 16 : i32
    %188 = tpu.dynamic_rotate %187 by %c16_i32_76 dim 1 : vector<2x128xf32>, i32 -> vector<2x128xf32>
    %189 = arith.addf %187, %188 : vector<2x128xf32>
    %c32_i32_77 = arith.constant 32 : i32
    %190 = tpu.dynamic_rotate %189 by %c32_i32_77 dim 1 : vector<2x128xf32>, i32 -> vector<2x128xf32>
    %191 = arith.addf %189, %190 : vector<2x128xf32>
    %c64_i32_78 = arith.constant 64 : i32
    %192 = tpu.dynamic_rotate %191 by %c64_i32_78 dim 1 : vector<2x128xf32>, i32 -> vector<2x128xf32>
    %193 = arith.addf %191, %192 : vector<2x128xf32>
    %c0_79 = arith.constant 0 : index
    %c0_80 = arith.constant 0 : index
    %194 = vector.load %arg7[%c0_79, %c0_80] : memref<128x2xf32, #tpu.memory_space<vmem>>, vector<128x2xf32>
    %cst_81 = arith.constant dense<0.000000e+00> : vector<2x2xf32>
    %195 = tpu.matmul %193, %194, %cst_81 {dimension_numbers = #tpu.dot_dimension_numbers<[1], [0], [0], [1], [0, 0, 1, 1], [], []>} : vector<2x128xf32>, vector<128x2xf32>, vector<2x2xf32> -> vector<2x2xf32>
    %c0_82 = arith.constant 0 : index
    %c0_83 = arith.constant 0 : index
    %196 = vector.load %arg8[%c0_82, %c0_83] : memref<1x2xf32, #tpu.memory_space<vmem>>, vector<1x2xf32>
    %197 = vector.broadcast %196 : vector<1x2xf32> to vector<2x2xf32>
    %198 = arith.addf %195, %197 : vector<2x2xf32>
    %cst_84 = arith.constant 0.000000e+00 : f32
    %199 = vector.broadcast %cst_84 : f32 to vector<2x2xf32>
    %200 = arith.maximumf %198, %199 : vector<2x2xf32>
    %c0_85 = arith.constant 0 : index
    %c0_86 = arith.constant 0 : index
    %201 = vector.load %arg9[%c0_85, %c0_86] : memref<2x128xf32, #tpu.memory_space<vmem>>, vector<2x128xf32>
    %cst_87 = arith.constant dense<0.000000e+00> : vector<2x128xf32>
    %202 = tpu.matmul %200, %201, %cst_87 {dimension_numbers = #tpu.dot_dimension_numbers<[1], [0], [0], [1], [0, 0, 1, 1], [], []>} : vector<2x2xf32>, vector<2x128xf32>, vector<2x128xf32> -> vector<2x128xf32>
    %c0_88 = arith.constant 0 : index
    %c0_89 = arith.constant 0 : index
    %203 = vector.load %arg10[%c0_88, %c0_89] : memref<1x128xf32, #tpu.memory_space<vmem>>, vector<1x128xf32>
    %204 = vector.broadcast %203 : vector<1x128xf32> to vector<2x128xf32>
    %205 = arith.addf %202, %204 : vector<2x128xf32>
    %206 = arith.negf %205 : vector<2x128xf32>
    %207 = math.exp %206 : vector<2x128xf32>
    %cst_90 = arith.constant 1.000000e+00 : f32
    %208 = vector.broadcast %cst_90 : f32 to vector<2x128xf32>
    %209 = arith.addf %208, %207 : vector<2x128xf32>
    %210 = arith.divf %208, %209 : vector<2x128xf32>
    %211 = vector.shape_cast %210 : vector<2x128xf32> to vector<2x1x128xf32>
    %212 = vector.broadcast %211 : vector<2x1x128xf32> to vector<2x16x128xf32>
    %213 = arith.mulf %182, %212 : vector<2x16x128xf32>
    %214 = vector.shape_cast %44 : vector<32x128xf32> to vector<2x16x128xf32>
    %215 = arith.addf %213, %214 : vector<2x16x128xf32>
    %c0_91 = arith.constant 0 : index
    %c0_92 = arith.constant 0 : index
    %c0_93 = arith.constant 0 : index
    %216 = vector.load %arg11[%c0_91, %c0_92, %c0_93] : memref<2x16x128xf32, #tpu.memory_space<vmem>>, vector<2x16x128xf32>
    tpu.vector_store %arg11[%c0_91, %c0_92, %c0_93], %215 {strides = array<i32>} : memref<2x16x128xf32, #tpu.memory_space<vmem>>, vector<2x16x128xf32>,
    return
  }
}

</mosaic_0001>

<bundles_post_ra>
// kernel: forward.1
= control target key start
LH: loop header
LB: loop body
LE: loop exit
PB: predicated region body
PF: predicated region fallthrough
CT: control target
= control target key end

     0   :  { %s1557_s25 = smov 16   ;;  %s1558_s26 = smov 32   ;;  %vm1560_vm5 = vmmov 1   ;;  %vm936_vm11 = vcmask 1041409   ;;  %vm1562_vm12 = vmmov 0   ;;  %vm1097_vm13 = vcmask 1041408   ;;  %s2078_s0 = inlined_call_operand.vmem [shape: f32[2,16,128], index: 0, kind: input, shape index: {}]   ;;  %s2079_s3 = inlined_call_operand.vmem [shape: bf16[384,128], index: 3, kind: input, shape index: {}]   ;;  %s2080_s1 = inlined_call_operand.vmem [shape: f32[1,128], index: 1, kind: input, shape index: {}]   ;;  %s2081_s2 = inlined_call_operand.vmem [shape: f32[1,128], index: 2, kind: input, shape index: {}]   ;;  %s2082_s6 = inlined_call_operand.vmem [shape: bf16[384,128], index: 6, kind: input, shape index: {}]   ;;  %s2083_s4 = inlined_call_operand.vmem [shape: f32[1,128], index: 4, kind: input, shape index: {}]   ;;  %s2084_s5 = inlined_call_operand.vmem [shape: f32[1,128], index: 5, kind: input, shape index: {}]   ;;  %s2085_s7 = inlined_call_operand.vmem [shape: f32[128,2], index: 7, kind: input, shape index: {}]   ;;  %s2086_s9 = inlined_call_operand.vmem [shape: f32[2,128], index: 9, kind: input, shape index: {}]   ;;  %s2087_s8 = inlined_call_operand.vmem [shape: f32[1,2], index: 8, kind: input, shape index: {}]   ;;  %s2088_s10 = inlined_call_operand.vmem [shape: f32[1,128], index: 10, kind: input, shape index: {}]   ;;  %s2089_s11 = inlined_call_operand.vmem [shape: f32[2,16,128], index: 11, kind: output, shape index: {}]  }
   0x1   :  { %v1627_v0 = vld [vmem:[%s2078_s0] sm:$0xff]  ;;  %v1632_v1 = vld [vmem:[%s2078_s0 + $0x8] sm:$0xff]  ;;  %v1637_v2 = vld [vmem:[%s2078_s0 + $0x10] sm:$0xff]  ;;  %s1559_s14 = smov 64   ;;  %vm1093_vm14 = vcmask 15360  }
   0x2   :  { %v43_v3 = vadd.f32 %v1632_v1, %v1627_v0  ;;  %v52_v4 = vmul.f32 %v1627_v0, %v1627_v0  ;;  %v53_v5 = vmul.f32 %v1632_v1, %v1632_v1  ;;  %v54_v6 = vmul.f32 %v1637_v2, %v1637_v2  ;;  %v1650_v7 = vld [vmem:[%s2078_s0 + $0x18] sm:$0xff]  ;;  %s1556_s0 = smov 8   ;;  %v1503_v40 = vld [vmem:[%s2079_s3 + $0x70] sm:$0xff]   ;;  %v1506_v44 = vld [vmem:[%s2079_s3 + $0x68] sm:$0xff]  }
   0x3   :  { %v55_v9 = vmul.f32 %v1650_v7, %v1650_v7  ;;  %v1500_v35 = vld [vmem:[%s2079_s3 + $0x78] sm:$0xff]   ;;  %v1504_v42 = vld [vmem:[%s2079_s3 + $0x30] sm:$0xff]   ;;  %v1507_v45 = vld [vmem:[%s2079_s3 + $0x28] sm:$0xff]  }
   0x4   :  { %v44_v8 = vadd.f32 %v43_v3, %v1637_v2  ;;  %v56_v10 = vadd.f32 %v53_v5, %v52_v4  ;;  %v1501_v37 = vld [vmem:[%s2079_s3 + $0x38] sm:$0xff]   ;;  %1317 = vmatprep.subr.bf16.mxu0 %v1500_v35  ;;  %v1505_v43 = vld [vmem:[%s2079_s3 + $0xb0] sm:$0xff]   ;;  %v1508_v46 = vld [vmem:[%s2079_s3 + $0xa8] sm:$0xff]  }
   0x5   :  { %v1502_v38 = vld [vmem:[%s2079_s3 + $0xb8] sm:$0xff]   ;;  %1318 = vmatpush3.bf16.msra.mxu0 %v1501_v37  ;;  %v1509_v47 = vld [vmem:[%s2079_s3 + $0x60] sm:$0xff]   ;;  %v1515_v53 = vld [vmem:[%s2079_s3 + $0x50] sm:$0xff]  }
   0x6   :  { %v45_v11 = vadd.f32 %v44_v8, %v1650_v7  ;;  %v57_v12 = vadd.f32 %v56_v10, %v54_v6  ;;  %1412 = vmatprep.subr.bf16.mxu1 %v1502_v38  ;;  %1319 = vmatprep.subr.bf16.mxu0 %v1503_v40  ;;  %v1510_v48 = vld [vmem:[%s2079_s3 + $0x20] sm:$0xff]   ;;  %v1512_v50 = vld [vmem:[%s2079_s3 + $0x58] sm:$0xff]   ;;  %v1516_v54 = vld [vmem:[%s2079_s3 + $0x10] sm:$0xff]  }
   0x7   :  { %1413 = vmatpush3.bf16.msra.mxu1 %v1502_v38  ;;  %v1511_v49 = vld [vmem:[%s2079_s3 + $0xa0] sm:$0xff]   ;;  %v1513_v51 = vld [vmem:[%s2079_s3 + $0x18] sm:$0xff]   ;;  %v1517_v55 = vld [vmem:[%s2079_s3 + $0x90] sm:$0xff]  }
   0x8   :  { %v46_v13 = vrot.slane %v45_v11, 4  ;;  %v58_v14 = vadd.f32 %v57_v12, %v55_v9  ;;  %1414 = vmatprep.subr.bf16.mxu1 %v1505_v43  ;;  %v1514_v52 = vld [vmem:[%s2079_s3 + $0x98] sm:$0xff]   ;;  %v1518_v56 = vld [vmem:[%s2079_s3 + $0x48] sm:$0xff]   ;;  %v1521_v59 = vld [vmem:[%s2079_s3 + $0x40] sm:$0xff]   ;;  %v94_v12 = vlaneseq }
   0x9   :  { %1320 = vmatpush3.bf16.msra.mxu0 %v1504_v42  ;;  %v1520_v57 = vld [vmem:[%s2079_s3 + $0x88] sm:$0xff]   ;;  %v1522_v60 = vld [vmem:[%s2079_s3] sm:$0xff]  }
   0xa   :  { %v47_v15 = vadd.f32 %v46_v13, %v45_v11  ;;  %v59_v16 = vrot.slane %v58_v14, 4  ;;  %1321 = vmatprep.subr.bf16.mxu0 %v1506_v44  ;;  %v1519_v58 = vld [vmem:[%s2079_s3 + $0x8] sm:$0xff]   ;;  %v1523_v61 = vld [vmem:[%s2079_s3 + $0x80] sm:$0xff]   ;;  %v1736_v13 = vshrl.u32 %v94_v12, 7 }
   0xb   :  { %1415 = vmatpush3.bf16.msra.mxu1 %v1505_v43 }
   0xc   :  { %v48_v17 = vrot.slane %v47_v15, 2  ;;  %v60_v18 = vadd.f32 %v59_v16, %v58_v14  ;;  %1416 = vmatprep.subr.bf16.mxu1 %v1508_v46  ;;  %v1739_v14 = vsub.s32 0, %v1736_v13  ;;  %v104_v16 = vld [vmem:[%s2080_s1] sm:$0x1]  ;;  %vm194_vm0 = vcmp.lt.s32.totalorder %v1736_v13, 1 }
   0xd   :  { %1322 = vmatpush3.bf16.msra.mxu0 %v1507_v45  ;;  %vm207_vm2 = vcmp.lt.s32.totalorder %v1736_v13, 7 }
   0xe   :  { %v49_v19 = vadd.f32 %v48_v17, %v47_v15  ;;  %v61_v20 = vrot.slane %v60_v18, 2  ;;  %1323 = vmatprep.subr.bf16.mxu0 %v1509_v47 }
   0xf   :  { %1417 = vmatpush3.bf16.msra.mxu1 %v1508_v46 }
  0x10   :  { %v50_v21 = vrot.slane %v49_v19, 1  ;;  %v62_v22 = vadd.f32 %v61_v20, %v60_v18  ;;  %1418 = vmatprep.subr.bf16.mxu1 %v1511_v49  ;;  %v131_v20 = vadd.s32 8, %v1736_v13 }
  0x11   :  { %1324 = vmatpush3.bf16.msra.mxu0 %v1510_v48 }
  0x12   :  { %v51_v23 = vadd.f32 %v50_v21, %v49_v19  ;;  %v63_v24 = vrot.slane %v62_v22, 1  ;;  %1325 = vmatprep.subr.bf16.mxu0 %v1512_v50 }
  0x13   :  { %1419 = vmatpush3.bf16.msra.mxu1 %v1511_v49 }
  0x14   :  { %65 = vrot.lane.b32.xlu0 %v51_v23, %s1556_s0  ;;  %v64_v25 = vadd.f32 %v63_v24, %v62_v22  ;;  %1420 = vmatprep.subr.bf16.mxu1 %v1514_v52 }
  0x15   :  { %1326 = vmatpush3.bf16.msra.mxu0 %v1513_v51 }
  0x16   :  { %1327 = vmatprep.subr.bf16.mxu0 %v1515_v53 }
  0x17   :  { %1421 = vmatpush3.bf16.msra.mxu1 %v1514_v52 }
  0x18   :  { %78 = vrot.lane.b32.xlu0 %v64_v25, %s1556_s0  ;;  %1422 = vmatprep.subr.bf16.mxu1 %v1517_v55 }
  0x19   :  { %1328 = vmatpush3.bf16.msra.mxu0 %v1516_v54 }
  0x1a   :  { %1329 = vmatprep.subr.bf16.mxu0 %v1518_v56 }
  0x1b   :  { %1423 = vmatpush3.bf16.msra.mxu1 %v1517_v55 }
  0x1c   :  { %1424 = vmatprep.subr.bf16.mxu1 %v1520_v57 }
  0x1d   :  { %1330 = vmatpush3.bf16.msra.mxu0 %v1519_v58 }
  0x1e   :  { %1331 = vmatprep.subr.bf16.mxu0 %v1521_v59 }
  0x1f   :  { %1425 = vmatpush3.bf16.msra.mxu1 %v1520_v57 }
  0x20   :  { %1426 = vmatprep.subr.bf16.mxu1 %v1523_v61 }
  0x21   :  { %1332 = vmatpush3.bf16.msra.mxu0 %v1522_v60 }
  0x23   :  { %1427 = vmatpush3.bf16.msra.mxu1 %v1523_v61 }
  0x86   :  { %v66_v26 = vpop.permute.xlu0 %65 }
  0x87   :  { %v67_v27 = vadd.f32 %v66_v26, %v51_v23  ;;  %v133_v26 = vadd.s32 24, %v1736_v13 }
  0x89   :  { %68 = vrot.lane.b32.xlu1 %v67_v27, %s1557_s25 }
  0x8a   :  { %v79_v28 = vpop.permute.xlu0 %78 }
  0x8b   :  { %v80_v29 = vadd.f32 %v79_v28, %v64_v25  ;;  %v1226_v25 = vld [vmem:[%s2081_s2] ss:$0 sm:$0xff] }
  0x8d   :  { %81 = vrot.lane.b32.xlu1 %v80_v29, %s1557_s25 }
  0xfb   :  { %v69_v30 = vpop.permute.xlu1 %68 }
  0xfc   :  { %v70_v31 = vadd.f32 %v69_v30, %v67_v27  ;;  %v138_v30 = vand.u32 15, %v1736_v13 }
  0xfe   :  { %71 = vrot.lane.b32.xlu0 %v70_v31, %s1558_s26  ;;  %vm1766_vm1 = vcmp.ne.s32.totalorder %v138_v30, 0 }
  0xff   :  { %v82_v32 = vpop.permute.xlu1 %81  ;;  %vm1794_vm6 = vmpackc.low %vm1560_vm5, %vm1766_vm1 }
 0x100   :  { %v83_v33 = vadd.f32 %v82_v32, %v80_v29 }
 0x102   :  { %84 = vrot.lane.b32.xlu1 %v83_v33, %s1558_s26 }
 0x170   :  { %v72_v34 = vpop.permute.xlu0 %71 }
 0x171   :  { %v73_v36 = vadd.f32 %v72_v34, %v70_v31  ;;  %v145_v31 = vand.u32 15, %v131_v20  ;;  %v132_v34 = vadd.s32 16, %v1736_v13 }
 0x173   :  { %74 = vrot.lane.b32.xlu0 %v73_v36, %s1559_s14  ;;  %vm1771_vm3 = vcmp.ne.s32.totalorder %v145_v31, 15  ;;  %v152_v53 = vand.u32 15, %v132_v34 }
 0x174   :  { %v85_v39 = vpop.permute.xlu1 %84  ;;  %vm1806_vm7 = vmpackc.low %vm1771_vm3, %vm1560_vm5 }
 0x175   :  { %v86_v41 = vadd.f32 %v85_v39, %v83_v33  ;;  %vm1314_vm9 = vcmp.ne.s32.totalorder %v152_v53, 0 }
 0x176   :  { %vm1835_vm10 = vmpackc.low %vm1560_vm5, %vm1314_vm9 }
 0x177   :  { %87 = vrot.lane.b32.xlu1 %v86_v41, %s1559_s14 }
 0x1e5   :  { %v75_v62 = vpop.permute.xlu0 %74 }
 0x1e6   :  { %v76_v63 = vadd.f32 %v75_v62, %v73_v36 }
 0x1e8   :  { %v77_v3 = vmul.f32 0.001953125, %v76_v63 }
 0x1e9   :  { %v88_v4 = vpop.permute.xlu1 %87 }
 0x1ea   :  { %v89_v5 = vadd.f32 %v88_v4, %v86_v41  ;;  %v91_v6 = vmul.f32 %v77_v3, %v77_v3  ;;  %v97_v15 = vrot.slane %v77_v3, %v1739_v14 }
 0x1ec   :  { %v90_v8 = vmul.f32 0.001953125, %v89_v5  ;;  %v98_v19 = vsub.f32 %v1627_v0, %v97_v15  ;;  %v99_v21 = vsub.f32 %v1632_v1, %v97_v15  ;;  %v100_v22 = vsub.f32 %v1637_v2, %v97_v15 }
 0x1ed   :  { %v101_v23 = vsub.f32 %v1650_v7, %v97_v15  ;;  %v159_v7 = vand.u32 15, %v133_v26 }
 0x1ee   :  { %v92_v9 = vsub.f32 %v90_v8, %v91_v6 }
 0x1ef   :  { %vm1783_vm4 = vcmp.ne.s32.totalorder %v159_v7, 15 }
 0x1f0   :  { %v93_v10 = vmax.f32 %v92_v9, 0.0  ;;  %vm1819_vm8 = vmpackc.low %vm1783_vm4, %vm1560_vm5 }
 0x1f2   :  { %v102_v11 = vadd.f32 1e-05, %v93_v10 }
 0x1f4   :  { %1548 = vrsqrt.f32 %v102_v11 }
 0x201   :  { %v1549_v17 = vpop.eup %1548 }
 0x202   :  { %v105_v18 = vmul.f32 %v1549_v17, %v104_v16 }
 0x204   :  { %v109_v24 = vrot.slane %v105_v18, %v1739_v14 }
 0x206   :  { %v110_v27 = vmul.f32 %v109_v24, %v98_v19  ;;  %v111_v28 = vmul.f32 %v109_v24, %v99_v21  ;;  %v113_v29 = vmul.f32 %v109_v24, %v101_v23  ;;  %v112_v0 = vmul.f32 %v109_v24, %v100_v22 }
 0x208   :  { %v121_v1 = vadd.f32 %v1226_v25, %v110_v27  ;;  %v122_v32 = vadd.f32 %v1226_v25, %v111_v28  ;;  %v124_v2 = vadd.f32 %v1226_v25, %v113_v29  ;;  %v123_v33 = vadd.f32 %v1226_v25, %v112_v0 }
 0x20a   :  { %v1758_v35 = vmax.f32 %v121_v1, 0.0  ;;  %v1760_v36 = vmax.f32 %v122_v32, 0.0  ;;  %v1762_v37 = vmax.f32 %v124_v2, 0.0  ;;  %v1764_v38 = vmax.f32 %v123_v33, 0.0 }
 0x20c   :  { %v217_v41 = vpack.c.bf16 %v1760_v36, %v1758_v35  ;;  %v190_v42 = vrot.slane %v1758_v35, 7  ;;  %v191_v43 = vrot.slane %v1760_v36, 7  ;;  %v193_v44 = vrot.slane %v1762_v37, 7 }
 0x20d   :  { %v203_v45 = vrot.slane %v1758_v35, 1  ;;  %v204_v46 = vrot.slane %v1760_v36, 1  ;;  %v205_v47 = vrot.slane %v1764_v38, 1  ;;  %v206_v52 = vrot.slane %v1762_v37, 1 }
 0x20e   :  { %446 = vmatprep.mubr.bf16.mxu0 %v217_v41  ;;  %v197_v49 = vsel %vm194_vm0, %v190_v42, %v191_v43  ;;  %v198_v50 = vsel %vm194_vm0, %v193_v44, %v190_v42  ;;  %v220_v58 = vpack.c.bf16 %v1762_v37, %v1764_v38  ;;  %v192_v63 = vrot.slane %v1764_v38, 7 }
 0x20f   :  { %v1253_v54 = vpack.c.bf16 %v197_v49, %v198_v50  ;;  %v209_v55 = vsel %vm207_vm2, %v204_v46, %v205_v47  ;;  %v210_v56 = vsel %vm207_vm2, %v203_v45, %v204_v46  ;;  %v208_v60 = vsel %vm207_vm2, %v205_v47, %v206_v52 }
 0x210   :  { %v1261_v59 = vpack.c.bf16 %v209_v55, %v210_v56  ;;  %v211_v61 = vsel %vm207_vm2, %v206_v52, %v203_v45  ;;  %v195_v4 = vsel %vm194_vm0, %v192_v63, %v193_v44  ;;  %v196_v5 = vsel %vm194_vm0, %v191_v43, %v192_v63 }
 0x211   :  { %1254 = vmatmul.mubr.msk.bf16.vlgmr.msra.gmra.mxu0 %vm1794_vm6, %v1253_v54  ;;  %v1265_v3 = vpack.c.bf16 %v211_v61, %v208_v60  ;;  %v1257_v8 = vpack.c.bf16 %v195_v4, %v196_v5  ;;  %v1524_v4 = vld [vmem:[%s2082_s6 + $0x78] sm:$0xff]  }
 0x212   :  { %1428 = vmatprep.mubr.msk.bf16.mxu1 %vm1806_vm7, %v1261_v59  ;;  %454 = vmatprep.mubr.bf16.mxu0 %v220_v58 }
 0x213   :  { %1429 = vmatmul.mubr.msk.bf16.vlgmr.msra.gmra.mxu1 %vm1819_vm8, %v1265_v3  ;;  %1355 = vmatprep.subr.bf16.mxu0 %v1524_v4 }
 0x219   :  { %1258 = vmatmul.mubr.msk.bf16.gmra.mxu0 %vm1835_vm10, %v1257_v8  ;;  %v1525_v8 = vld [vmem:[%s2082_s6 + $0x38] sm:$0xff]  }
 0x21a   :  { %1356 = vmatpush3.bf16.msra.mxu0 %v1525_v8 }
 0x2d1   :  { %v1333_v9 = vpop.f32.mrf.mxu0 }
 0x2d3   :  { %v1430_v10 = vpop.f32.mrf.mxu1  ;;  %v1334_v11 = vpop.f32.mrf.mxu0 }
 0x2d4   :  { %v1335_v18 = vadd.f32 %v1334_v11, %v1333_v9 }
 0x2d5   :  { %v497_v12 = vpop.f32.mrf.mxu1  ;;  %v1336_v15 = vpop.f32.mrf.mxu0 }
 0x2d6   :  { %v1843_v24 = vadd.f32 %v1335_v18, %v497_v12  ;;  %v1527_v12 = vld [vmem:[%s2082_s6 + $0x70] sm:$0xff]   ;;  %v1531_v18 = vld [vmem:[%s2082_s6 + $0x28] sm:$0xff]  }
 0x2d7   :  { %v1431_v16 = vpop.f32.mrf.mxu1  ;;  %v1337_v17 = vpop.f32.mrf.mxu0  ;;  %1357 = vmatprep.subr.bf16.mxu0 %v1527_v12 }
 0x2d8   :  { %v1338_v19 = vadd.f32 %v1337_v17, %v1336_v15  ;;  %v521_v0 = vmul.f32 %v1843_v24, %v1843_v24  ;;  %v1528_v15 = vld [vmem:[%s2082_s6 + $0x30] sm:$0xff]   ;;  %v1530_v17 = vld [vmem:[%s2082_s6 + $0x68] sm:$0xff]  }
 0x2d9   :  { %v500_v20 = vpop.f32.mrf.mxu1  ;;  %v1339_v21 = vpop.f32.mrf.mxu0  ;;  %1358 = vmatpush3.bf16.msra.mxu0 %v1528_v15 }
 0x2da   :  { %v1841_v22 = vadd.f32 %v1338_v19, %v500_v20  ;;  %v1532_v19 = vld [vmem:[%s2082_s6 + $0xa8] sm:$0xff]   ;;  %1359 = vmatprep.subr.bf16.mxu0 %v1530_v17  ;;  %v1533_v20 = vld [vmem:[%s2082_s6 + $0x60] sm:$0xff]  }
 0x2db   :  { %v1340_v23 = vpop.f32.mrf.mxu0 }
 0x2dc   :  { %v1341_v25 = vadd.f32 %v1340_v23, %v1339_v21  ;;  %v522_v27 = vmul.f32 %v1841_v22, %v1841_v22  ;;  %v512_v30 = vadd.f32 %v1841_v22, %v1843_v24  ;;  %v1534_v21 = vld [vmem:[%s2082_s6 + $0x20] sm:$0xff]  }
 0x2dd   :  { %v1342_v26 = vpop.f32.mrf.mxu0  ;;  %1360 = vmatpush3.bf16.msra.mxu0 %v1531_v18  ;;  %v1535_v23 = vld [vmem:[%s2082_s6 + $0xa0] sm:$0xff]  }
 0x2de   :  { %v1847_v28 = vadd.f32 %v1430_v10, %v1341_v25  ;;  %v525_v32 = vadd.f32 %v522_v27, %v521_v0  ;;  %v1526_v10 = vld [vmem:[%s2082_s6 + $0xb8] sm:$0xff]   ;;  %1361 = vmatprep.subr.bf16.mxu0 %v1533_v20  ;;  %v1541_v0 = vld [vmem:[%s2082_s6 + $0x90] sm:$0xff]  }
 0x2df   :  { %v1343_v29 = vpop.f32.mrf.mxu0  ;;  %1432 = vmatprep.subr.bf16.mxu1 %v1526_v10  ;;  %v1536_v25 = vld [vmem:[%s2082_s6 + $0x58] sm:$0xff]  }
 0x2e0   :  { %v523_v31 = vmul.f32 %v1847_v28, %v1847_v28  ;;  %v1344_v1 = vadd.f32 %v1343_v29, %v1342_v26  ;;  %v513_v2 = vadd.f32 %v512_v30, %v1847_v28  ;;  %1433 = vmatpush3.bf16.msra.mxu1 %v1526_v10  ;;  %v1537_v26 = vld [vmem:[%s2082_s6 + $0x18] sm:$0xff]   ;;  %v1539_v29 = vld [vmem:[%s2082_s6 + $0x50] sm:$0xff]  }
 0x2e1   :  { %1362 = vmatpush3.bf16.msra.mxu0 %v1534_v21  ;;  %v1538_v27 = vld [vmem:[%s2082_s6 + $0x98] sm:$0xff]   ;;  %v1540_v30 = vld [vmem:[%s2082_s6 + $0x10] sm:$0xff]  }
 0x2e2   :  { %v1856_v33 = vadd.f32 %v1431_v16, %v1344_v1  ;;  %v526_v7 = vadd.f32 %v525_v32, %v523_v31  ;;  %v1529_v16 = vld [vmem:[%s2082_s6 + $0xb0] sm:$0xff]   ;;  %1363 = vmatprep.subr.bf16.mxu0 %v1536_v25  ;;  %v1542_v31 = vld [vmem:[%s2082_s6 + $0x48] sm:$0xff]  }
 0x2e3   :  { %1434 = vmatprep.subr.bf16.mxu1 %v1529_v16  ;;  %v1544_v1 = vld [vmem:[%s2082_s6 + $0x88] sm:$0xff]  }
 0x2e4   :  { %v514_v34 = vadd.f32 %v513_v2, %v1856_v33  ;;  %v524_v39 = vmul.f32 %v1856_v33, %v1856_v33  ;;  %1435 = vmatpush3.bf16.msra.mxu1 %v1529_v16  ;;  %v1543_v32 = vld [vmem:[%s2082_s6 + $0x8] sm:$0xff]   ;;  %v1545_v2 = vld [vmem:[%s2082_s6 + $0x40] sm:$0xff]  }
 0x2e5   :  { %1436 = vmatprep.subr.bf16.mxu1 %v1532_v19  ;;  %1364 = vmatpush3.bf16.msra.mxu0 %v1537_v26 }
 0x2e6   :  { %v515_v40 = vrot.slane %v514_v34, 4  ;;  %v527_v41 = vadd.f32 %v526_v7, %v524_v39  ;;  %1365 = vmatprep.subr.bf16.mxu0 %v1539_v29  ;;  %v1546_v7 = vld [vmem:[%s2082_s6] sm:$0xff]  }
 0x2e8   :  { %v516_v42 = vadd.f32 %v515_v40, %v514_v34  ;;  %v528_v43 = vrot.slane %v527_v41, 4  ;;  %1437 = vmatpush3.bf16.msra.mxu1 %v1532_v19  ;;  %v1547_v34 = vld [vmem:[%s2082_s6 + $0x80] sm:$0xff]  }
 0x2e9   :  { %1438 = vmatprep.subr.bf16.mxu1 %v1535_v23  ;;  %1366 = vmatpush3.bf16.msra.mxu0 %v1540_v30 }
 0x2ea   :  { %v517_v44 = vrot.slane %v516_v42, 2  ;;  %v529_v45 = vadd.f32 %v528_v43, %v527_v41  ;;  %1367 = vmatprep.subr.bf16.mxu0 %v1542_v31 }
 0x2ec   :  { %v518_v46 = vadd.f32 %v517_v44, %v516_v42  ;;  %v530_v47 = vrot.slane %v529_v45, 2  ;;  %1439 = vmatpush3.bf16.msra.mxu1 %v1535_v23 }
 0x2ed   :  { %1440 = vmatprep.subr.bf16.mxu1 %v1538_v27  ;;  %1368 = vmatpush3.bf16.msra.mxu0 %v1543_v32 }
 0x2ee   :  { %v519_v48 = vrot.slane %v518_v46, 1  ;;  %v531_v49 = vadd.f32 %v530_v47, %v529_v45  ;;  %1369 = vmatprep.subr.bf16.mxu0 %v1545_v2 }
 0x2f0   :  { %v520_v50 = vadd.f32 %v519_v48, %v518_v46  ;;  %v532_v52 = vrot.slane %v531_v49, 1  ;;  %1441 = vmatpush3.bf16.msra.mxu1 %v1538_v27 }
 0x2f1   :  { %1442 = vmatprep.subr.bf16.mxu1 %v1541_v0  ;;  %1370 = vmatpush3.bf16.msra.mxu0 %v1546_v7 }
 0x2f2   :  { %534 = vrot.lane.b32.xlu0 %v520_v50, %s1556_s0  ;;  %v533_v53 = vadd.f32 %v532_v52, %v531_v49 }
 0x2f4   :  { %547 = vrot.lane.b32.xlu1 %v533_v53, %s1556_s0  ;;  %1443 = vmatpush3.bf16.msra.mxu1 %v1541_v0 }
 0x2f5   :  { %1444 = vmatprep.subr.bf16.mxu1 %v1544_v1 }
 0x2f8   :  { %1445 = vmatpush3.bf16.msra.mxu1 %v1544_v1 }
 0x2f9   :  { %1446 = vmatprep.subr.bf16.mxu1 %v1547_v34 }
 0x2fc   :  { %1447 = vmatpush3.bf16.msra.mxu1 %v1547_v34 }
 0x364   :  { %v535_v54 = vpop.permute.xlu0 %534 }
 0x365   :  { %v536_v55 = vadd.f32 %v535_v54, %v520_v50  ;;  %v573_v50 = vld [vmem:[%s2083_s4] sm:$0x1] }
 0x366   :  { %v548_v56 = vpop.permute.xlu1 %547 }
 0x367   :  { %v549_v58 = vadd.f32 %v548_v56, %v533_v53  ;;  %537 = vrot.lane.b32.xlu0 %v536_v55, %s1557_s25 }
 0x369   :  { %550 = vrot.lane.b32.xlu1 %v549_v58, %s1557_s25 }
 0x3d9   :  { %v538_v59 = vpop.permute.xlu0 %537 }
 0x3da   :  { %v539_v60 = vadd.f32 %v538_v59, %v536_v55 }
 0x3db   :  { %v551_v61 = vpop.permute.xlu1 %550 }
 0x3dc   :  { %v552_v63 = vadd.f32 %v551_v61, %v549_v58  ;;  %540 = vrot.lane.b32.xlu0 %v539_v60, %s1558_s26 }
 0x3de   :  { %553 = vrot.lane.b32.xlu1 %v552_v63, %s1558_s26 }
 0x44e   :  { %v541_v3 = vpop.permute.xlu0 %540 }
 0x44f   :  { %v542_v5 = vadd.f32 %v541_v3, %v539_v60  ;;  %v1267_v60 = vld [vmem:[%s2084_s5] ss:$0 sm:$0xff] }
 0x450   :  { %v554_v9 = vpop.permute.xlu1 %553 }
 0x451   :  { %v555_v11 = vadd.f32 %v554_v9, %v552_v63  ;;  %543 = vrot.lane.b32.xlu0 %v542_v5, %s1559_s14 }
 0x453   :  { %556 = vrot.lane.b32.xlu1 %v555_v11, %s1559_s14 }
 0x4c3   :  { %v544_v39 = vpop.permute.xlu0 %543 }
 0x4c4   :  { %v545_v40 = vadd.f32 %v544_v39, %v542_v5 }
 0x4c5   :  { %v557_v41 = vpop.permute.xlu1 %556 }
 0x4c6   :  { %v546_v42 = vmul.f32 0.001953125, %v545_v40  ;;  %v558_v43 = vadd.f32 %v557_v41, %v555_v11 }
 0x4c8   :  { %v560_v44 = vmul.f32 %v546_v42, %v546_v42  ;;  %v559_v45 = vmul.f32 0.001953125, %v558_v43  ;;  %v566_v49 = vrot.slane %v546_v42, %v1739_v14 }
 0x4ca   :  { %v561_v46 = vsub.f32 %v559_v45, %v560_v44  ;;  %v567_v54 = vsub.f32 %v1843_v24, %v566_v49  ;;  %v568_v55 = vsub.f32 %v1841_v22, %v566_v49  ;;  %v569_v56 = vsub.f32 %v1847_v28, %v566_v49 }
 0x4cb   :  { %v570_v58 = vsub.f32 %v1856_v33, %v566_v49 }
 0x4cc   :  { %v562_v47 = vmax.f32 %v561_v46, 0.0 }
 0x4ce   :  { %v571_v48 = vadd.f32 1e-05, %v562_v47 }
 0x4d0   :  { %1550 = vrsqrt.f32 %v571_v48 }
 0x4dd   :  { %v1551_v52 = vpop.eup %1550 }
 0x4de   :  { %v574_v53 = vmul.f32 %v1551_v52, %v573_v50 }
 0x4e0   :  { %v578_v59 = vrot.slane %v574_v53, %v1739_v14 }
 0x4e2   :  { %v579_v61 = vmul.f32 %v578_v59, %v567_v54  ;;  %v580_v63 = vmul.f32 %v578_v59, %v568_v55  ;;  %v581_v3 = vmul.f32 %v578_v59, %v569_v56  ;;  %v582_v4 = vmul.f32 %v578_v59, %v570_v58 }
 0x4e4   :  { %v590_v5 = vadd.f32 %v1267_v60, %v579_v61  ;;  %v591_v8 = vadd.f32 %v1267_v60, %v580_v63  ;;  %v592_v9 = vadd.f32 %v1267_v60, %v581_v3  ;;  %v593_v24 = vadd.f32 %v1267_v60, %v582_v4 }
 0x4e6   :  { %v594_v10 = vmax.f32 %v590_v5, 0.0  ;;  %v595_v22 = vmax.f32 %v591_v8, 0.0  ;;  %v597_v11 = vmax.f32 %v593_v24, 0.0  ;;  %v596_v28 = vmax.f32 %v592_v9, 0.0 }
 0x4e8   :  { %v598_v12 = vrot.slane %v594_v10, 7  ;;  %v599_v33 = vrot.slane %v595_v22, 7  ;;  %v601_v15 = vrot.slane %v597_v11, 7  ;;  %v623_v16 = vpack.c.bf16 %v595_v22, %v594_v10 }
 0x4e9   :  { %v610_v17 = vrot.slane %v594_v10, 1  ;;  %v611_v18 = vrot.slane %v595_v22, 1  ;;  %v612_v19 = vrot.slane %v596_v28, 1  ;;  %v613_v23 = vrot.slane %v597_v11, 1 }
 0x4ea   :  { %v604_v20 = vsel %vm194_vm0, %v598_v12, %v599_v33  ;;  %v605_v21 = vsel %vm194_vm0, %v601_v15, %v598_v12  ;;  %852 = vmatprep.mubr.bf16.mxu0 %v623_v16  ;;  %v626_v29 = vpack.c.bf16 %v597_v11, %v596_v28  ;;  %v600_v1 = vrot.slane %v596_v28, 7 }
 0x4eb   :  { %v1294_v25 = vpack.c.bf16 %v604_v20, %v605_v21  ;;  %v615_v26 = vsel %vm207_vm2, %v611_v18, %v612_v19  ;;  %v616_v27 = vsel %vm207_vm2, %v610_v17, %v611_v18  ;;  %v614_v30 = vsel %vm207_vm2, %v612_v19, %v613_v23 }
 0x4ec   :  { %v1302_v0 = vpack.c.bf16 %v615_v26, %v616_v27  ;;  %v617_v31 = vsel %vm207_vm2, %v613_v23, %v610_v17  ;;  %v602_v2 = vsel %vm194_vm0, %v600_v1, %v601_v15  ;;  %v603_v7 = vsel %vm194_vm0, %v599_v33, %v600_v1  ;;  %v1001_v26 = vld [vmem:[%s2085_s7 + $0x78] sm:$0xff]  ;;  %v1000_v27 = vld [vmem:[%s2085_s7 + $0x70] sm:$0xff]  ;;  %v998_v1 = vld [vmem:[%s2085_s7 + $0x60] sm:$0xff] }
 0x4ed   :  { %1295 = vmatmul.mubr.msk.bf16.vlgmr.msra.gmra.mxu0 %vm1794_vm6, %v1294_v25  ;;  %v1306_v32 = vpack.c.bf16 %v617_v31, %v614_v30  ;;  %v1298_v34 = vpack.c.bf16 %v602_v2, %v603_v7  ;;  %v1561_v25 = vmov 0.0   ;;  %v999_v30 = vld [vmem:[%s2085_s7 + $0x68] sm:$0xff]  ;;  %v996_v2 = vld [vmem:[%s2085_s7 + $0x50] sm:$0xff] }
 0x4ee   :  { %1448 = vmatprep.mubr.msk.bf16.mxu1 %vm1806_vm7, %v1302_v0  ;;  %860 = vmatprep.mubr.bf16.mxu0 %v626_v29  ;;  %v995_v7 = vld [vmem:[%s2085_s7 + $0x48] sm:$0xff] }
 0x4ef   :  { %1449 = vmatmul.mubr.msk.bf16.vlgmr.msra.gmra.mxu1 %vm1819_vm8, %v1306_v32  ;;  %1452 = vmatprep.subr.mxu0 %v1561_v25  ;;  %v997_v32 = vld [vmem:[%s2085_s7 + $0x58] sm:$0xff] }
 0x4f0   :  { %1487 = vmatprep.subr.mxu1 %v1561_v25  ;;  %1453 = vmatpush3.msra.mxu0 %v1001_v26 }
 0x4f1   :  { %1454 = vmatprep.subr.mxu0 %v1561_v25  ;;  %1489 = vmatprep.mubr.msk.f32.mxu1 %vm1562_vm12, %v1561_v25 }
 0x4f2   :  { %1455 = vmatpush3.msra.mxu0 %v1000_v27 }
 0x4f3   :  { %1456 = vmatprep.subr.mxu0 %v1561_v25 }
 0x4f4   :  { %1457 = vmatpush3.msra.mxu0 %v999_v30 }
 0x4f5   :  { %1299 = vmatmul.mubr.msk.bf16.gmra.mxu0 %vm1835_vm10, %v1298_v34  ;;  %1458 = vmatprep.subr.mxu0 %v1561_v25  ;;  %v994_v34 = vld [vmem:[%s2085_s7 + $0x40] sm:$0xff] }
 0x4f6   :  { %1459 = vmatpush3.msra.mxu0 %v998_v1  ;;  %1484 = vmatprep.mubr.msk.f32.mxu0 %vm1562_vm12, %v1561_v25 }
 0x4f7   :  { %1460 = vmatprep.subr.mxu0 %v1561_v25 }
 0x4f8   :  { %1461 = vmatpush3.msra.mxu0 %v997_v32 }
 0x4f9   :  { %1462 = vmatprep.subr.mxu0 %v1561_v25 }
 0x4fa   :  { %1463 = vmatpush3.msra.mxu0 %v996_v2 }
 0x4fb   :  { %1464 = vmatprep.subr.mxu0 %v1561_v25 }
 0x4fc   :  { %1465 = vmatpush3.msra.mxu0 %v995_v7 }
 0x4fd   :  { %1466 = vmatprep.subr.mxu0 %v1561_v25 }
 0x4fe   :  { %1467 = vmatpush3.msra.mxu0 %v994_v34 }
 0x4ff   :  { %1468 = vmatprep.subr.mxu0 %v1561_v25 }
 0x5ad   :  { %v1371_v51 = vpop.f32.mrf.mxu0 }
 0x5af   :  { %v1450_v39 = vpop.f32.mrf.mxu1  ;;  %v1372_v40 = vpop.f32.mrf.mxu0 }
 0x5b0   :  { %v1373_v42 = vadd.f32 %v1372_v40, %v1371_v51  ;;  %v993_v51 = vld [vmem:[%s2085_s7 + $0x38] sm:$0xff]  ;;  %v991_v40 = vld [vmem:[%s2085_s7 + $0x28] sm:$0xff] }
 0x5b1   :  { %v903_v41 = vpop.f32.mrf.mxu1  ;;  %v1374_v57 = vpop.f32.mrf.mxu0  ;;  %1469 = vmatpush3.msra.mxu0 %v993_v51 }
 0x5b2   :  { %v1977_v47 = vadd.f32 %v1373_v42, %v903_v41  ;;  %1470 = vmatprep.subr.mxu0 %v1561_v25  ;;  %v990_v41 = vld [vmem:[%s2085_s7 + $0x20] sm:$0xff]  ;;  %v988_v42 = vld [vmem:[%s2085_s7 + $0x10] sm:$0xff] }
 0x5b3   :  { %v1451_v43 = vpop.f32.mrf.mxu1  ;;  %v1375_v44 = vpop.f32.mrf.mxu0 }
 0x5b4   :  { %v1376_v62 = vadd.f32 %v1375_v44, %v1374_v57  ;;  %v989_v57 = vld [vmem:[%s2085_s7 + $0x18] sm:$0xff] }
 0x5b5   :  { %v906_v45 = vpop.f32.mrf.mxu1  ;;  %v1377_v46 = vpop.f32.mrf.mxu0 }
 0x5b6   :  { %v1979_v48 = vadd.f32 %v1376_v62, %v906_v45  ;;  %v987_v62 = vld [vmem:[%s2085_s7 + $0x8] sm:$0xff]  ;;  %v986_v45 = vld [vmem:[%s2085_s7] sm:$0xff] }
 0x5b7   :  { %v1378_v49 = vpop.f32.mrf.mxu0 }
 0x5b8   :  { %v918_v6 = vadd.f32 %v1979_v48, %v1977_v47  ;;  %v1379_v53 = vadd.f32 %v1378_v49, %v1377_v46  ;;  %v1085_v49 = vld [vmem:[%s2086_s9] sm:$0x3] }
 0x5b9   :  { %v1380_v50 = vpop.f32.mrf.mxu0  ;;  %1488 = vmatpush3.msk.msra.mxu1 %vm1097_vm13, %v1085_v49 }
 0x5ba   :  { %v919_v52 = vrot.slane %v918_v6, 4  ;;  %v1983_v59 = vadd.f32 %v1450_v39, %v1379_v53  ;;  %v992_v39 = vld [vmem:[%s2085_s7 + $0x30] sm:$0xff] }
 0x5bb   :  { %v1381_v54 = vpop.f32.mrf.mxu0  ;;  %1471 = vmatpush3.msra.mxu0 %v992_v39 }
 0x5bc   :  { %v920_v55 = vadd.f32 %v919_v52, %v918_v6  ;;  %v1382_v56 = vadd.f32 %v1381_v54, %v1380_v50  ;;  %1472 = vmatprep.subr.mxu0 %v1561_v25 }
 0x5bd   :  { %1473 = vmatpush3.msra.mxu0 %v991_v40 }
 0x5be   :  { %v921_v58 = vrot.slane %v920_v55, 2  ;;  %v1985_v60 = vadd.f32 %v1451_v43, %v1382_v56  ;;  %1474 = vmatprep.subr.mxu0 %v1561_v25 }
 0x5bf   :  { %1475 = vmatpush3.msra.mxu0 %v990_v41 }
 0x5c0   :  { %v925_v61 = vadd.f32 %v1985_v60, %v1983_v59  ;;  %v922_v63 = vadd.f32 %v921_v58, %v920_v55  ;;  %1476 = vmatprep.subr.mxu0 %v1561_v25 }
 0x5c1   :  { %1477 = vmatpush3.msra.mxu0 %v989_v57 }
 0x5c2   :  { %v926_v3 = vrot.slane %v925_v61, 4  ;;  %v923_v5 = vrot.slane %v922_v63, 1  ;;  %1478 = vmatprep.subr.mxu0 %v1561_v25 }
 0x5c3   :  { %1479 = vmatpush3.msra.mxu0 %v988_v42 }
 0x5c4   :  { %v927_v4 = vadd.f32 %v926_v3, %v925_v61  ;;  %v924_v24 = vadd.f32 %v923_v5, %v922_v63  ;;  %1480 = vmatprep.subr.mxu0 %v1561_v25  ;;  %v1308_v63 = vld [vmem:[%s2087_s8] ss:$0 sm:$0xff] }
 0x5c5   :  { %1481 = vmatpush3.msra.mxu0 %v987_v62 }
 0x5c6   :  { %v928_v8 = vrot.slane %v927_v4, 2  ;;  %v932_v11 = vmul.f32 0.00390625, %v924_v24  ;;  %1482 = vmatprep.subr.mxu0 %v1561_v25 }
 0x5c7   :  { %1483 = vmatpush3.msra.mxu0 %v986_v45 }
 0x5c8   :  { %v929_v9 = vadd.f32 %v928_v8, %v927_v4 }
 0x5ca   :  { %v930_v10 = vrot.slane %v929_v9, 1 }
 0x5cc   :  { %v931_v22 = vadd.f32 %v930_v10, %v929_v9  ;;  %v1309_v9 = vld [vmem:[%s2088_s10] ss:$0 sm:$0xff] }
 0x5ce   :  { %v933_v28 = vmul.f32 0.00390625, %v931_v22 }
 0x5d0   :  { %v937_v12 = vsel %vm936_vm11, %v933_v28, %v932_v11 }
 0x5d1   :  { %939 = vrot.lane.b32.xlu0 %v937_v12, %s1556_s0 }
 0x643   :  { %v940_v33 = vpop.permute.xlu0 %939 }
 0x644   :  { %v942_v15 = vrot.slane %v940_v33, 1  ;;  %v945_v17 = vadd.f32 %v940_v33, %v932_v11  ;;  %v1563_v33 = vmov 1966171168  }
 0x646   :  { %v946_v16 = vadd.f32 %v942_v15, %v933_v28  ;;  %v1179_v15 = vunpack.c.l.s4 %v1563_v33 }
 0x648   :  { %v949_v18 = vrot.slane %v946_v16, 7 }
 0x64a   :  { %v950_v19 = vsel %vm936_vm11, %v949_v18, %v945_v17 }
 0x64b   :  { %952 = vrot.lane.b32.xlu1 %v950_v19, %s1557_s25 }
 0x6bd   :  { %v953_v20 = vpop.permute.xlu1 %952 }
 0x6be   :  { %v955_v21 = vrot.slane %v953_v20, 1  ;;  %v958_v29 = vadd.f32 %v953_v20, %v945_v17 }
 0x6c0   :  { %v959_v23 = vadd.f32 %v955_v21, %v946_v16  ;;  %v1180_v16 = vunpack.c.0.s8 %v1179_v15 }
 0x6c2   :  { %v962_v0 = vrot.slane %v959_v23, 7  ;;  %v1183_v17 = vsub.s32 %v1180_v16, %v1736_v13 }
 0x6c4   :  { %v963_v31 = vsel %vm936_vm11, %v962_v0, %v958_v29 }
 0x6c5   :  { %965 = vrot.lane.b32.xlu0 %v963_v31, %s1558_s26 }
 0x737   :  { %v966_v43 = vpop.permute.xlu0 %965 }
 0x738   :  { %v968_v44 = vrot.slane %v966_v43, 1  ;;  %v971_v6 = vadd.f32 %v966_v43, %v958_v29 }
 0x73a   :  { %v972_v46 = vadd.f32 %v968_v44, %v959_v23 }
 0x73c   :  { %v975_v50 = vrot.slane %v972_v46, 7 }
 0x73e   :  { %v976_v52 = vsel %vm936_vm11, %v975_v50, %v971_v6 }
 0x73f   :  { %978 = vrot.lane.b32.xlu1 %v976_v52, %s1559_s14 }
 0x7b1   :  { %v979_v53 = vpop.permute.xlu1 %978 }
 0x7b2   :  { %v981_v54 = vrot.slane %v979_v53, 1  ;;  %v984_v56 = vadd.f32 %v979_v53, %v971_v6 }
 0x7b4   :  { %v985_v55 = vadd.f32 %v981_v54, %v972_v46 }
 0x7b6   :  { %v1011_v58 = vrot.slane %v985_v55, 7 }
 0x7b8   :  { %v1012_v61 = vsel %vm936_vm11, %v1011_v58, %v984_v56 }
 0x7b9   :  { %1485 = vmatmul.mubr.f32.vlgmr.msra.gmra.mxu0 %v1012_v61 }
 0x879   :  { %v1080_v3 = vpop.f32.mrf.mxu0 }
 0x87a   :  { %v1081_v4 = vadd.f32 %v1308_v63, %v1080_v3 }
 0x87b   :  { %v1486_v5 = vpop.f32.mrf.mxu0 }
 0x87c   :  { %v1084_v8 = vmax.f32 %v1081_v4, 0.0 }
 0x87e   :  { %1490 = vmatmul.mubr.msk.f32.vlgmr.msra.gmra.mxu1 %vm1093_vm14, %v1084_v8 }
 0x93e   :  { %v1167_v24 = vpop.f32.mrf.mxu1 }
 0x93f   :  { %v1168_v10 = vadd.f32 %v1309_v9, %v1167_v24 }
 0x940   :  { %v1491_v22 = vpop.f32.mrf.mxu1 }
 0x941   :  { %v1312_v11 = vmul.f32 -1.442695, %v1168_v10 }
 0x943   :  { %1552 = vpow2.f32 %v1312_v11 }
 0x950   :  { %v1553_v28 = vpop.eup %1552 }
 0x951   :  { %v1174_v12 = vadd.f32 1.0, %v1553_v28 }
 0x953   :  { %1554 = vrcp.f32 %v1174_v12 }
 0x960   :  { %v1555_v18 = vpop.eup %1554 }
 0x961   :  { %v1184_v19 = vrot.slane %v1555_v18, %v1183_v17 }
 0x963   :  { %v1185_v20 = vcombine.high %v1184_v19, %v1184_v19  ;;  %v1192_v21 = vrot.slane %v1184_v19, %v1183_v17 }
 0x965   :  { %v1199_v23 = vrot.slane %v1185_v20, %v1183_v17  ;;  %v1203_v25 = vrot.slane %v1192_v21, %v1739_v14 }
 0x967   :  { %v1207_v26 = vrot.slane %v1199_v23, %v1739_v14  ;;  %v1210_v27 = vmul.f32 %v1203_v25, %v1977_v47  ;;  %v1211_v29 = vmul.f32 %v1203_v25, %v1979_v48 }
 0x969   :  { %v1212_v0 = vmul.f32 %v1207_v26, %v1983_v59  ;;  %v1213_v30 = vmul.f32 %v1207_v26, %v1985_v60  ;;  %v1214_v31 = vadd.f32 %v1210_v27, %v1758_v35  ;;  %v1215_v13 = vadd.f32 %v1211_v29, %v1760_v36 }
 0x96b   :  { %v1216_v1 = vadd.f32 %v1212_v0, %v1764_v38  ;;  %v1217_v32 = vadd.f32 %v1213_v30, %v1762_v37  ;;  %1218 = vst [vmem:[%s2089_s11] sm:$0xff] %v1214_v31  ;;  %1219 = vst [vmem:[%s2089_s11 + $0x8] sm:$0xff] %v1215_v13 }
 0x96d   :  { %1220 = vst [vmem:[%s2089_s11 + $0x10] sm:$0xff] %v1216_v1  ;;  %1221 = vst [vmem:[%s2089_s11 + $0x18] sm:$0xff] %v1217_v32 }

</bundles_post_ra>
